<compile_context>
chip_gen: v7x
topology: tpu7x:2x2x1
jax: 0.10.0
libtpu: 0.0.40
codegen_flags: <defaults>
</compile_context>

<pallas_src>
import functools
import math

import jax
import jax.numpy as jnp
from jax.experimental import pallas as pl
from jax.experimental.pallas import tpu as pltpu


def _round_up(n, m):
    return ((n + m - 1) // m) * m


def _pool_mlp_kernel(x_ref, w_ref, b_ref, o_ref, acc_ref, *, inv_hw):
    # x_ref:  (bg_tile, kC, hw_tile)   w_ref: (kC, kout)   b_ref: (1, kout) f32
    # o_ref:  (bg_tile, kout)          acc_ref: (bg_tile, kC) f32 scratch
    hw_idx = pl.program_id(1)

    @pl.when(hw_idx == 0)
    def _init():
        acc_ref[...] = jnp.zeros_like(acc_ref)

    # Partial spatial sum for this H*W chunk, accumulated directly in f32.
    acc_ref[...] += jnp.sum(x_ref[...], axis=-1, dtype=jnp.float32)

    @pl.when(hw_idx == pl.num_programs(1) - 1)
    def _finalize():
        # Adaptive average pool to 1x1, then Linear (MXU, native weight dtype) + bias + ReLU.
        pooled = (acc_ref[...] * inv_hw).astype(w_ref.dtype)          # (bg_tile, kC)
        y = jnp.dot(pooled, w_ref[...], preferred_element_type=jnp.float32)
        y = y + b_ref[...]                                            # (1, kout) f32 broadcast
        o_ref[...] = jnp.maximum(y, 0.0).astype(o_ref.dtype)


def spatial_avg_pool_mlp(x_nchw, weight, bias, *, block_batch=None, block_hw=None):
    """x_nchw: (B, C, H, W); weight: (out, C) PyTorch nn.Linear layout; bias: (out,)."""
    B, C, H, W = x_nchw.shape
    out_f = weight.shape[0]
    HW = H * W
    itemsize = jnp.dtype(x_nchw.dtype).itemsize

    # ---- fold k consecutive batch rows so the sublane dim (k*C) is a multiple of 8 ----
    k = 8 // math.gcd(C, 8)
    if k > 1 and (k * C) * (k * out_f) * itemsize > (2 << 20):
        k = 1  # pathological large C*out: keep the block-diagonal weight tiny / resident
    kC, kout = k * C, k * out_f

    w_t = weight.T                                                    # (C, out)
    w_bd = w_t if k == 1 else jnp.kron(jnp.eye(k, dtype=w_t.dtype), w_t)   # (kC, kout)
    b_bd = jnp.tile(bias.astype(jnp.float32), k).reshape(1, kout)     # (1, kout) f32

    # ---- generation-aware VMEM budgets ------------------------------------------------
    try:
        phys_vmem = int(getattr(pltpu.get_tpu_info(), "vmem_capacity_bytes", 0)) or (64 << 20)
    except Exception:
        phys_vmem = 64 << 20                       # assume the smallest (v7x per-core VMEM)
    blk_budget = int(min(16 << 20, max(4 << 20, (phys_vmem - (16 << 20)) // 3)))

    sub = lambda n: _round_up(n, 8)
    lane = lambda n: _round_up(n, 128)

    # ---- spatial chunking (inner "arbitrary" grid axis) -------------------------------
    if block_hw is not None:
        hw_tile = HW if block_hw >= HW else max(128, (block_hw // 128) * 128)
    elif 8 * sub(kC) * lane(HW) * itemsize <= blk_budget:
        hw_tile = HW                               # whole H*W fits at bg_tile >= 8
    else:
        hw_tile = max(128, (blk_budget // (8 * sub(kC) * itemsize)) // 128 * 128)
    if hw_tile >= HW:
        hw_tile, hw_pad = HW, HW
    else:
        hw_pad = _round_up(HW, hw_tile)
    num_hw = hw_pad // hw_tile

    # ---- batch-group tiling (outer "parallel" grid axis) ------------------------------
    G = pl.cdiv(B, k)                              # number of k-row batch groups
    grp_bytes = sub(kC) * lane(hw_tile) * itemsize
    if block_batch is not None:
        bg = max(1, block_batch // k)
    else:
        bg = max(1, blk_budget // grp_bytes)
    bg_tile = min(max(8, (bg // 8) * 8), _round_up(G, 8))
    if block_batch is None and _round_up(G, 8) >= 16 and pl.cdiv(G, bg_tile) == 1:
        # Enough work for >= 2 blocks: keep both v7x TensorCores busy on the parallel axis.
        bg_tile = _round_up(pl.cdiv(G, 2), 8)
    g_pad = _round_up(G, bg_tile)
    num_b = g_pad // bg_tile
    b_pad = g_pad * k

    # ---- glue reshape / zero padding (zeros don't change the spatial sum) --------------
    x_flat = x_nchw.reshape(B, C, HW)
    if b_pad != B or hw_pad != HW:
        x_flat = jnp.pad(x_flat, ((0, b_pad - B), (0, 0), (0, hw_pad - HW)))
    x_g = x_flat.reshape(g_pad, kC, hw_pad)        # pure row-major relabel (no data movement)

    # ---- explicit scoped-VMEM limit sized to the actual working set --------------------
    x_blk = bg_tile * sub(kC) * lane(hw_tile) * itemsize
    o_blk = sub(bg_tile) * lane(kout) * itemsize
    w_blk = sub(kC) * lane(kout) * jnp.dtype(w_bd.dtype).itemsize
    acc_blk = sub(bg_tile) * lane(kC) * 4
    need = 2 * x_blk + 2 * o_blk + 2 * w_blk + 2 * 8 * lane(kout) * 4 + acc_blk
    vmem_limit = int(min(phys_vmem - (8 << 20), max(32 << 20, need + (4 << 20))))
    vmem_limit = max(vmem_limit, need + (2 << 20))

    flops = B * C * HW + 2 * B * C * out_f + 2 * B * out_f
    bytes_accessed = (x_g.size * itemsize
                      + w_bd.size * jnp.dtype(w_bd.dtype).itemsize
                      + b_bd.size * 4
                      + b_pad * out_f * itemsize)

    out = pl.pallas_call(
        functools.partial(_pool_mlp_kernel, inv_hw=1.0 / HW),
        out_shape=jax.ShapeDtypeStruct((g_pad, kout), x_nchw.dtype),
        grid=(num_b, num_hw),
        in_specs=[
            # x: streamed per (batch-group tile, H*W chunk); double-buffered by the pipeline.
            pl.BlockSpec((bg_tile, kC, hw_tile), lambda i, j: (i, 0, j)),
            # weight / bias: constant index_map -> VMEM resident across all grid steps.
            pl.BlockSpec((kC, kout), lambda i, j: (0, 0)),
            pl.BlockSpec((1, kout), lambda i, j: (0, 0)),
        ],
        out_specs=pl.BlockSpec((bg_tile, kout), lambda i, j: (i, 0)),
        scratch_shapes=[pltpu.VMEM((bg_tile, kC), jnp.float32)],
        compiler_params=pltpu.CompilerParams(
            dimension_semantics=("parallel", "arbitrary"),
            vmem_limit_bytes=vmem_limit,
        ),
        cost_estimate=pl.CostEstimate(
            flops=flops, transcendentals=0, bytes_accessed=bytes_accessed),
    )(x_g, w_bd, b_bd)

    # (g_pad, k*out) row-major relabels directly back to (b_pad, out).
    return out.reshape(g_pad * k, out_f)[:B]


if __name__ == "__main__":
    in_channels = 3
    out_channels = 8

    key = jax.random.PRNGKey(0)
    kx, kw, kb, kx2 = jax.random.split(key, 4)

    # Deterministic params mimicking nn.Linear default init: U(-1/sqrt(C), 1/sqrt(C)).
    bound = 1.0 / (in_channels ** 0.5)
    weight = jax.random.uniform(kw, (out_channels, in_channels),
                                minval=-bound, maxval=bound, dtype=jnp.float32)
    bias = jax.random.uniform(kb, (out_channels,),
                              minval=-bound, maxval=bound, dtype=jnp.float32)

    def reference(x):
        return jnp.maximum(jnp.mean(x, axis=(2, 3)) @ weight.T + bias, 0.0)

    # 1) Module-spec shapes.
    x1 = jax.random.normal(kx, (16, in_channels, 16, 16), dtype=jnp.float32)
    out1 = jax.block_until_ready(spatial_avg_pool_mlp(x1, weight, bias))
    assert out1.shape == (16, out_channels)
    assert jnp.allclose(out1, reference(x1), atol=1e-5, rtol=1e-5)

    # 2) Larger shapes exercising both grid axes (4 batch blocks x 4 spatial chunks).
    x2 = jax.random.normal(kx2, (256, in_channels, 32, 32), dtype=jnp.float32)
    out2 = jax.block_until_ready(
        spatial_avg_pool_mlp(x2, weight, bias, block_batch=64, block_hw=256))
    assert out2.shape == (256, out_channels)
    assert jnp.allclose(out2, reference(x2), atol=1e-5, rtol=1e-5)

    print("KERNEL_OK")
</pallas_src>

<mosaic_0001>
module attributes {stable_mosaic.version = 11 : i64} {
  func.func @_pool_mlp_kernel(%arg0: i32, %arg1: i32, %arg2: memref<8x24x256xf32, #tpu.memory_space<vmem>>, %arg3: memref<24x64xf32, #tpu.memory_space<vmem>>, %arg4: memref<1x64xf32, #tpu.memory_space<vmem>>, %arg5: memref<8x64xf32, #tpu.memory_space<vmem>>, %arg6: memref<8x24xf32, #tpu.memory_space<vmem>>) attributes {dimension_semantics = [#tpu.dimension_semantics<parallel>, #tpu.dimension_semantics<arbitrary>], iteration_bounds = array<i64: 1, 1>, scalar_prefetch = 0 : i64, scratch_operands = 1 : i64, tpu.core_type = #tpu.core_type<tc>, window_params = [{transform_indices = @transform_0, window_bounds = array<i64: 8, 24, 256>}, {pipeline_mode = #tpu.pipeline_mode<synchronous>, transform_indices = @transform_1, window_bounds = array<i64: 24, 64>}, {pipeline_mode = #tpu.pipeline_mode<synchronous>, transform_indices = @transform_2, window_bounds = array<i64: 1, 64>}, {transform_indices = @transform_3, window_bounds = array<i64: 8, 64>}]} {
    %c0_i32 = arith.constant 0 : i32
    %0 = arith.cmpi eq, %arg1, %c0_i32 : i32
    %1 = arith.extui %0 : i1 to i32
    %c0_i32_0 = arith.constant 0 : i32
    %2 = arith.cmpi ne, %1, %c0_i32_0 : i32
    scf.if %2 {
      %cst_9 = arith.constant 0.000000e+00 : f32
      %11 = vector.broadcast %cst_9 : f32 to vector<8x24xf32>
      %c0_10 = arith.constant 0 : index
      %c0_11 = arith.constant 0 : index
      %12 = vector.load %arg6[%c0_10, %c0_11] : memref<8x24xf32, #tpu.memory_space<vmem>>, vector<8x24xf32>
      tpu.vector_store %arg6[%c0_10, %c0_11], %11 {strides = array<i32>} : memref<8x24xf32, #tpu.memory_space<vmem>>, vector<8x24xf32>,
    } else {
    }
    %c0 = arith.constant 0 : index
    %c0_1 = arith.constant 0 : index
    %3 = vector.load %arg6[%c0, %c0_1] : memref<8x24xf32, #tpu.memory_space<vmem>>, vector<8x24xf32>
    %c0_2 = arith.constant 0 : index
    %c0_3 = arith.constant 0 : index
    %c0_4 = arith.constant 0 : index
    %4 = vector.load %arg2[%c0_2, %c0_3, %c0_4] : memref<8x24x256xf32, #tpu.memory_space<vmem>>, vector<8x24x256xf32>
    %cst = arith.constant dense<0.000000e+00> : vector<8x24xf32>
    %5 = vector.multi_reduction <add>, %4, %cst [2] : vector<8x24x256xf32> to vector<8x24xf32>
    %6 = arith.addf %3, %5 : vector<8x24xf32>
    %c0_5 = arith.constant 0 : index
    %c0_6 = arith.constant 0 : index
    %7 = vector.load %arg6[%c0_5, %c0_6] : memref<8x24xf32, #tpu.memory_space<vmem>>, vector<8x24xf32>
    tpu.vector_store %arg6[%c0_5, %c0_6], %6 {strides = array<i32>} : memref<8x24xf32, #tpu.memory_space<vmem>>, vector<8x24xf32>,
    %c0_i32_7 = arith.constant 0 : i32
    %8 = arith.cmpi eq, %arg1, %c0_i32_7 : i32
    %9 = arith.extui %8 : i1 to i32
    %c0_i32_8 = arith.constant 0 : i32
    %10 = arith.cmpi ne, %9, %c0_i32_8 : i32
    scf.if %10 {
      %c0_9 = arith.constant 0 : index
      %c0_10 = arith.constant 0 : index
      %11 = vector.load %arg6[%c0_9, %c0_10] : memref<8x24xf32, #tpu.memory_space<vmem>>, vector<8x24xf32>
      %cst_11 = arith.constant 3.906250e-03 : f32
      %12 = vector.broadcast %cst_11 : f32 to vector<8x24xf32>
      %13 = arith.mulf %11, %12 : vector<8x24xf32>
      %c0_12 = arith.constant 0 : index
      %c0_13 = arith.constant 0 : index
      %14 = vector.load %arg3[%c0_12, %c0_13] : memref<24x64xf32, #tpu.memory_space<vmem>>, vector<24x64xf32>
      %cst_14 = arith.constant dense<0.000000e+00> : vector<8x64xf32>
      %15 = tpu.matmul %13, %14, %cst_14 {dimension_numbers = #tpu.dot_dimension_numbers<[1], [0], [0], [1], [0, 0, 1, 1], [], []>} : vector<8x24xf32>, vector<24x64xf32>, vector<8x64xf32> -> vector<8x64xf32>
      %c0_15 = arith.constant 0 : index
      %c0_16 = arith.constant 0 : index
      %16 = vector.load %arg4[%c0_15, %c0_16] : memref<1x64xf32, #tpu.memory_space<vmem>>, vector<1x64xf32>
      %17 = vector.broadcast %16 : vector<1x64xf32> to vector<8x64xf32>
      %18 = arith.addf %15, %17 : vector<8x64xf32>
      %cst_17 = arith.constant 0.000000e+00 : f32
      %19 = vector.broadcast %cst_17 : f32 to vector<8x64xf32>
      %20 = arith.maximumf %18, %19 : vector<8x64xf32>
      %c0_18 = arith.constant 0 : index
      %c0_19 = arith.constant 0 : index
      %21 = vector.load %arg5[%c0_18, %c0_19] : memref<8x64xf32, #tpu.memory_space<vmem>>, vector<8x64xf32>
      tpu.vector_store %arg5[%c0_18, %c0_19], %20 {strides = array<i32>} : memref<8x64xf32, #tpu.memory_space<vmem>>, vector<8x64xf32>,
    } else {
    }
    return
  }
  func.func @transform_0(%arg0: i32, %arg1: i32) -> (i32, i32, i32) {
    %c0_i32 = arith.constant 0 : i32
    %c0_i32_0 = arith.constant 0 : i32
    return %arg0, %c0_i32, %arg1 : i32, i32, i32
  }
  func.func @transform_1(%arg0: i32, %arg1: i32) -> (i32, i32) {
    %c0_i32 = arith.constant 0 : i32
    %c0_i32_0 = arith.constant 0 : i32
    %c0_i32_1 = arith.constant 0 : i32
    return %c0_i32, %c0_i32_0 : i32, i32
  }
  func.func @transform_2(%arg0: i32, %arg1: i32) -> (i32, i32) {
    %c0_i32 = arith.constant 0 : i32
    %c0_i32_0 = arith.constant 0 : i32
    %c0_i32_1 = arith.constant 0 : i32
    return %c0_i32, %c0_i32_0 : i32, i32
  }
  func.func @transform_3(%arg0: i32, %arg1: i32) -> (i32, i32) {
    %c0_i32 = arith.constant 0 : i32
    %c0_i32_0 = arith.constant 0 : i32
    return %arg0, %c0_i32 : i32, i32
  }
}

</mosaic_0001>

<bundles_post_ra>
// kernel: tpu_custom_call.1
= control target key start
LH: loop header
LB: loop body
LE: loop exit
PB: predicated region body
PF: predicated region fallthrough
CT: control target
= control target key end

     0   :  { %8 = vsyncpa [#allocation4], 0  ;;  %s657_s0 = inlined_call_operand.hbm [shape: f32[8,24,256], index: 0, kind: input, shape index: {}]   ;;  %s658_s1 = inlined_call_operand.hbm [shape: f32[24,64], index: 1, kind: input, shape index: {}]   ;;  %s659_s2 = inlined_call_operand.vmem [shape: f32[1,64], index: 2, kind: input, shape index: {}]   ;;  %s660_s3 = inlined_call_operand.hbm [shape: f32[8,64], index: 3, kind: output, shape index: {}]  }
   0x1   :  { %9 = vsyncpa [#allocation7], 0 }
   0x2   :  { %10 = vsyncpa [#allocation5], 0  ;;  %s537_s12 = smov [#allocation3]   ;;  %s465_s16 = scalar_lea.hbm %s657_s0, 6144 }
   0x3   :  { %s16_s13 = sshll.u32 %s537_s12, 4  ;;  %p466_p0 = scmp.ne.s32.totalorder %s657_s0, %s465_s16  ;;  %s17_s13 = int_to_ptr.vmem [resolvable:$true] %s16_s13 }
   0x4   :  { %p469_p1 = scmp.lt.u32.totalorder %s465_s16, %s657_s0 }
   0x6   :  { %p471_p2 = pnand %p469_p1, %p466_p0 }
   0x8   :  { %474 = shalt.err (!%p471_p2)
}
   0x9   :  { %s475_s21 = scalar_lea.vmem %s17_s13, 6144  ;;  %p480_p4 = scmp.lt.s32.totalorder %s17_s13, %s17_s13 }
   0xa   :  { %p476_p3 = scmp.ne.s32.totalorder %s17_s13, %s475_s21  ;;  %p481_p5 = scmp.lt.s32.totalorder %s475_s21, %s475_s21 }
   0xc   :  { %p482_p6 = por %p481_p5, %p480_p4 }
   0xe   :  { %p483_p7 = pnand %p482_p6, %p476_p3 }
  0x10   :  { %486 = shalt.err (!%p483_p7)
}
  0x11   :  { %s538_s22 = smov 256   ;;  %s539_s23 = smov 16  }
  0x12   :  { %22 = dma.hbm_to_vmem [thread:$0]  %s657_s0, 6144, %s17_s13, [#allocation4], %s538_s22, %s538_s22, %s539_s23  }
  0x13   :  { %s540_s26 = smov [#allocation6]   ;;  %s487_s30 = scalar_lea.hbm %s658_s1, 384 }
  0x14   :  { %s28_s27 = sshll.u32 %s540_s26, 4  ;;  %p488_p8 = scmp.ne.s32.totalorder %s658_s1, %s487_s30  ;;  %s29_s27 = int_to_ptr.vmem [resolvable:$true] %s28_s27 }
  0x15   :  { %p491_p9 = scmp.lt.u32.totalorder %s487_s30, %s658_s1 }
  0x17   :  { %p493_p10 = pnand %p491_p9, %p488_p8 }
  0x19   :  { %496 = shalt.err (!%p493_p10)
}
  0x1a   :  { %s497_s8 = scalar_lea.vmem %s29_s27, 384  ;;  %p502_p12 = scmp.lt.s32.totalorder %s29_s27, %s29_s27 }
  0x1b   :  { %p498_p11 = scmp.ne.s32.totalorder %s29_s27, %s497_s8  ;;  %p503_p13 = scmp.lt.s32.totalorder %s497_s8, %s497_s8 }
  0x1d   :  { %p504_p0 = por %p503_p13, %p502_p12 }
  0x1f   :  { %p505_p1 = pnand %p504_p0, %p498_p11 }
  0x21   :  { %508 = shalt.err (!%p505_p1)
}
  0x22   :  { %s541_s0 = smov 128   ;;  %s542_s9 = smov 8  }
  0x23   :  { %34 = dma.hbm_to_vmem [thread:$0]  %s658_s1, 384, %s29_s27, [#allocation7], %s541_s0, %s541_s0, %s542_s9  }
  0x24   :  { %531 = dma.done.wait [#allocation4], 6144  }
  0x25   :  { %532 = vsyncadd [#allocation4], 4294961152 }
  0x26   :  { %533 = dma.done.wait [#allocation7], 384  }
  0x27   :  { %534 = vsyncadd [#allocation7], 4294966912  ;;  %v56_v0 = vld [vmem:[#allocation3 + $0x30] sm:$0xff]  ;;  %v57_v1 = vld [vmem:[#allocation3 + $0x38] sm:$0xff]  ;;  %vm47_vm0 = vcmask 195584   ;;  %vm545_vm1 = vmmov 0  }
  0x28   :  { %v50_v2 = vld [vmem:[#allocation3] sm:$0xff]  ;;  %v107_v3 = vadd.f32 %v57_v1, %v56_v0  ;;  %v51_v4 = vld [vmem:[#allocation3 + $0x8] sm:$0xff]  ;;  %v52_v8 = vld [vmem:[#allocation3 + $0x10] sm:$0xff]  ;;  %vm205_vm2 = vcmask 130112   ;;  %vm212_vm3 = vcmask 195712   ;;  %vm312_vm4 = vcmask 1041409  }
  0x29   :  { %v58_v5 = vld [vmem:[#allocation3 + $0x40] sm:$0xff]  ;;  %v59_v6 = vld [vmem:[#allocation3 + $0x48] sm:$0xff]  ;;  %v98_v7 = vadd.f32 %v51_v4, %v50_v2  ;;  %v53_v9 = vld [vmem:[#allocation3 + $0x18] sm:$0xff]  ;;  %vm314_vm5 = vcmask 1042434   ;;  %vm316_vm6 = vcmask 1043459   ;;  %vm318_vm7 = vcmask 1044484  }
  0x2a   :  { %108 = vadd.xlane.f32.xlu1 %v107_v3  ;;  %v110_v10 = vadd.f32 %v59_v6, %v58_v5  ;;  %v101_v11 = vadd.f32 %v53_v9, %v52_v8  ;;  %v60_v12 = vld [vmem:[#allocation3 + $0x50] sm:$0xff]  ;;  %v61_v13 = vld [vmem:[#allocation3 + $0x58] sm:$0xff]  ;;  %v54_v14 = vld [vmem:[#allocation3 + $0x20] sm:$0xff]  ;;  %v543_v8 = vmov 0.0   ;;  %vm320_vm8 = vcmask 1045509   ;;  %s546_s13 = smov [#allocation8]  }
  0x2b   :  { %99 = vadd.xlane.f32.xlu0 %v98_v7  ;;  %v55_v15 = vld [vmem:[#allocation3 + $0x28] sm:$0xff]  ;;  %v113_v16 = vadd.f32 %v61_v13, %v60_v12  ;;  %v64_v18 = vld [vmem:[#allocation3 + $0x70] sm:$0xff]  ;;  %v65_v19 = vld [vmem:[#allocation3 + $0x78] sm:$0xff]  ;;  %48 = vst.msk [vmem:[#allocation2] sm:$0xff] %vm47_vm0, %v543_v8  ;;  %449 = vmatprep.mubr.msk.f32.mxu0 %vm545_vm1, %v543_v8  ;;  %vm322_vm9 = vcmask 1046534   ;;  %vm324_vm10 = vcmask 1047559  }
  0x2c   :  { %v104_v17 = vadd.f32 %v55_v15, %v54_v14  ;;  %v62_v20 = vld [vmem:[#allocation3 + $0x60] sm:$0xff]  ;;  %v63_v21 = vld [vmem:[#allocation3 + $0x68] sm:$0xff]  ;;  %v119_v22 = vadd.f32 %v65_v19, %v64_v18  ;;  %v68_v24 = vld [vmem:[#allocation3 + $0x90] sm:$0xff]  ;;  %s427_s14 = sshll.u32 %s546_s13, 4  ;;  %vm419_vm11 = vcmask 523264   ;;  %s428_s14 = int_to_ptr.vmem [resolvable:$true] %s427_s14 }
  0x2d   :  { %v116_v23 = vadd.f32 %v63_v21, %v62_v20  ;;  %v69_v25 = vld [vmem:[#allocation3 + $0x98] sm:$0xff]  ;;  %v66_v26 = vld [vmem:[#allocation3 + $0x80] sm:$0xff]  ;;  %v67_v27 = vld [vmem:[#allocation3 + $0x88] sm:$0xff]  ;;  %s509_s15 = scalar_lea.vmem %s428_s14, 128  ;;  %p514_p3 = scmp.lt.s32.totalorder %s428_s14, %s428_s14 }
  0x2e   :  { %111 = vadd.xlane.f32.xlu1 %v110_v10  ;;  %v125_v28 = vadd.f32 %v69_v25, %v68_v24  ;;  %v122_v29 = vadd.f32 %v67_v27, %v66_v26  ;;  %v72_v30 = vld [vmem:[#allocation3 + $0xb0] sm:$0xff]  ;;  %v73_v31 = vld [vmem:[#allocation3 + $0xb8] sm:$0xff]  ;;  %v70_v32 = vld [vmem:[#allocation3 + $0xa0] sm:$0xff]  ;;  %v194_v24 = vlaneseq  ;;  %p510_p2 = scmp.ne.s32.totalorder %s428_s14, %s509_s15  ;;  %p515_p4 = scmp.lt.s32.totalorder %s509_s15, %s509_s15 }
  0x2f   :  { %102 = vadd.xlane.f32.xlu0 %v101_v11  ;;  %v71_v33 = vld [vmem:[#allocation3 + $0xa8] sm:$0xff]  ;;  %v131_v34 = vadd.f32 %v73_v31, %v72_v30  ;;  %v76_v36 = vld [vmem:[#allocation3 + $0xd0] sm:$0xff]  ;;  %v77_v37 = vld [vmem:[#allocation3 + $0xd8] sm:$0xff]  ;;  %v544_v11 = vmov 0.0|0.0  }
  0x30   :  { %v128_v35 = vadd.f32 %v71_v33, %v70_v32  ;;  %v74_v38 = vld [vmem:[#allocation3 + $0xc0] sm:$0xff]  ;;  %v75_v39 = vld [vmem:[#allocation3 + $0xc8] sm:$0xff]  ;;  %v137_v40 = vadd.f32 %v77_v37, %v76_v36  ;;  %v80_v42 = vld [vmem:[#allocation3 + $0xf0] sm:$0xff]  ;;  %452 = vmatprep.subr.bf16.mxu0 %v544_v11  ;;  %v195_v27 = vand.u32 127, %v194_v24  ;;  %v197_v31 = vshrl.u32 %v194_v24, 7  ;;  %p516_p5 = por %p515_p4, %p514_p3 }
  0x31   :  { %v134_v41 = vadd.f32 %v75_v39, %v74_v38  ;;  %v81_v43 = vld [vmem:[#allocation3 + $0xf8] sm:$0xff]  ;;  %v78_v44 = vld [vmem:[#allocation3 + $0xe0] sm:$0xff]  ;;  %v79_v45 = vld [vmem:[#allocation3 + $0xe8] sm:$0xff] }
  0x32   :  { %114 = vadd.xlane.f32.xlu1 %v113_v16  ;;  %v143_v46 = vadd.f32 %v81_v43, %v80_v42  ;;  %v140_v47 = vadd.f32 %v79_v45, %v78_v44  ;;  %v84_v48 = vld [vmem:[#allocation3 + $0x110] sm:$0xff]  ;;  %v85_v49 = vld [vmem:[#allocation3 + $0x118] sm:$0xff]  ;;  %v82_v50 = vld [vmem:[#allocation3 + $0x100] sm:$0xff]  ;;  %v207_v32 = vadd.s32 4294967280, %v195_v27  ;;  %v594_v36 = vsub.s32 %v195_v27, %v197_v31  ;;  %p517_p6 = pnand %p516_p5, %p510_p2 }
  0x33   :  { %105 = vadd.xlane.f32.xlu0 %v104_v17  ;;  %v83_v51 = vld [vmem:[#allocation3 + $0x108] sm:$0xff]  ;;  %v149_v52 = vadd.f32 %v85_v49, %v84_v48  ;;  %v88_v54 = vld [vmem:[#allocation3 + $0x130] sm:$0xff]  ;;  %v89_v55 = vld [vmem:[#allocation3 + $0x138] sm:$0xff] }
  0x34   :  { %v146_v53 = vadd.f32 %v83_v51, %v82_v50  ;;  %v86_v56 = vld [vmem:[#allocation3 + $0x120] sm:$0xff]  ;;  %v87_v57 = vld [vmem:[#allocation3 + $0x128] sm:$0xff]  ;;  %v155_v58 = vadd.f32 %v89_v55, %v88_v54  ;;  %v92_v60 = vld [vmem:[#allocation3 + $0x150] sm:$0xff]  ;;  %v596_v37 = vsub.s32 %v207_v32, %v197_v31 }
  0x35   :  { %v152_v59 = vadd.f32 %v87_v57, %v86_v56  ;;  %v93_v61 = vld [vmem:[#allocation3 + $0x158] sm:$0xff]  ;;  %v90_v62 = vld [vmem:[#allocation3 + $0x140] sm:$0xff]  ;;  %v91_v63 = vld [vmem:[#allocation3 + $0x148] sm:$0xff] }
  0x36   :  { %120 = vadd.xlane.f32.xlu1 %v119_v22  ;;  %v161_v0 = vadd.f32 %v93_v61, %v92_v60  ;;  %v158_v1 = vadd.f32 %v91_v63, %v90_v62  ;;  %v96_v2 = vld [vmem:[#allocation3 + $0x170] sm:$0xff]  ;;  %v97_v3 = vld [vmem:[#allocation3 + $0x178] sm:$0xff]  ;;  %v94_v4 = vld [vmem:[#allocation3 + $0x160] sm:$0xff] }
  0x37   :  { %117 = vadd.xlane.f32.xlu0 %v116_v23  ;;  %v95_v5 = vld [vmem:[#allocation3 + $0x168] sm:$0xff]  ;;  %v167_v6 = vadd.f32 %v97_v3, %v96_v2  ;;  %v335_v9 = vld [vmem:[#allocation6] sm:$0xff]  ;;  %v337_v13 = vld [vmem:[#allocation6 + $0x10] sm:$0xff] }
  0x38   :  { %v164_v7 = vadd.f32 %v95_v5, %v94_v4  ;;  %v336_v10 = vld [vmem:[#allocation6 + $0x8] sm:$0xff] }
  0x39   :  { %v453_v12 = vpack.c.bf16 %v336_v10, %v335_v9 }
  0x3a   :  { %126 = vadd.xlane.f32.xlu1 %v125_v28 }
  0x3b   :  { %123 = vadd.xlane.f32.xlu0 %v122_v29  ;;  %454 = vmatpush3.bf16.msra.mxu0 %v453_v12  ;;  %v200_v29 = vadd.s32 4294967288, %v195_v27 }
  0x3c   :  { %447 = vmatprep.subr.mxu0 %v543_v8 }
  0x3e   :  { %132 = vadd.xlane.f32.xlu1 %v131_v34  ;;  %v592_v34 = vsub.s32 %v200_v29, %v197_v31 }
  0x3f   :  { %129 = vadd.xlane.f32.xlu0 %v128_v35  ;;  %448 = vmatpush3.msra.mxu0 %v337_v13 }
  0x42   :  { %138 = vadd.xlane.f32.xlu1 %v137_v40 }
  0x43   :  { %135 = vadd.xlane.f32.xlu0 %v134_v41 }
  0x46   :  { %144 = vadd.xlane.f32.xlu1 %v143_v46 }
  0x47   :  { %141 = vadd.xlane.f32.xlu0 %v140_v47 }
  0x4a   :  { %150 = vadd.xlane.f32.xlu1 %v149_v52 }
  0x4b   :  { %147 = vadd.xlane.f32.xlu0 %v146_v53 }
  0x4e   :  { %156 = vadd.xlane.f32.xlu1 %v155_v58 }
  0x4f   :  { %153 = vadd.xlane.f32.xlu0 %v152_v59 }
  0x52   :  { %162 = vadd.xlane.f32.xlu1 %v161_v0 }
  0x53   :  { %159 = vadd.xlane.f32.xlu0 %v158_v1 }
  0x56   :  { %168 = vadd.xlane.f32.xlu1 %v167_v6 }
  0x57   :  { %165 = vadd.xlane.f32.xlu0 %v164_v7 }
  0xb7   :  { %v109_v14 = vpop.xlane.xlu1 %108 }
  0xb8   :  { %v100_v15 = vpop.xlane.xlu0 %99  ;;  %v217_v42 = vrot.slane %v109_v14, %v594_v36 }
  0xb9   :  { %v199_v44 = vrot.slane %v100_v15, %v594_v36 }
  0xbb   :  { %v112_v16 = vpop.xlane.xlu1 %111 }
  0xbc   :  { %v103_v17 = vpop.xlane.xlu0 %102  ;;  %v221_v39 = vrot.slane %v112_v16, %v592_v34 }
  0xbd   :  { %v204_v41 = vrot.slane %v103_v17, %v592_v34 }
  0xbe   :  { %v222_v48 = vsel %vm205_vm2, %v221_v39, %v217_v42 }
  0xbf   :  { %v115_v18 = vpop.xlane.xlu1 %114  ;;  %v206_v52 = vsel %vm205_vm2, %v204_v41, %v199_v44 }
  0xc0   :  { %v106_v19 = vpop.xlane.xlu0 %105  ;;  %v226_v43 = vrot.slane %v115_v18, %v596_v37 }
  0xc1   :  { %v211_v45 = vrot.slane %v106_v19, %v596_v37 }
  0xc2   :  { %v227_v56 = vsel %vm212_vm3, %v226_v43, %v222_v48 }
  0xc3   :  { %v121_v20 = vpop.xlane.xlu1 %120  ;;  %v213_v60 = vsel %vm212_vm3, %v211_v45, %v206_v52 }
  0xc4   :  { %v118_v21 = vpop.xlane.xlu0 %117  ;;  %v235_v49 = vrot.slane %v121_v20, %v592_v34  ;;  %v313_v11 = vsel %vm312_vm4, %v227_v56, %v213_v60 }
  0xc5   :  { %v231_v50 = vrot.slane %v118_v21, %v594_v36 }
  0xc7   :  { %v127_v22 = vpop.xlane.xlu1 %126  ;;  %v236_v1 = vsel %vm205_vm2, %v235_v49, %v231_v50 }
  0xc8   :  { %v124_v23 = vpop.xlane.xlu0 %123  ;;  %v245_v53 = vrot.slane %v127_v22, %v594_v36 }
  0xc9   :  { %v240_v54 = vrot.slane %v124_v23, %v596_v37 }
  0xcb   :  { %v133_v25 = vpop.xlane.xlu1 %132  ;;  %v241_v6 = vsel %vm212_vm3, %v240_v54, %v236_v1 }
  0xcc   :  { %v130_v26 = vpop.xlane.xlu0 %129  ;;  %v254_v57 = vrot.slane %v133_v25, %v596_v37  ;;  %v315_v14 = vsel %vm314_vm5, %v241_v6, %v313_v11 }
  0xcd   :  { %v249_v46 = vrot.slane %v130_v26, %v592_v34  ;;  %v49_v26 = vld [vmem:[#allocation2] sm:$0xff] }
  0xcf   :  { %v139_v28 = vpop.xlane.xlu1 %138  ;;  %v250_v61 = vsel %vm205_vm2, %v249_v46, %v245_v53 }
  0xd0   :  { %v136_v30 = vpop.xlane.xlu0 %135  ;;  %v263_v58 = vrot.slane %v139_v28, %v592_v34  ;;  %v255_v9 = vsel %vm212_vm3, %v254_v57, %v250_v61 }
  0xd1   :  { %v259_v59 = vrot.slane %v136_v30, %v594_v36  ;;  %v317_v19 = vsel %vm316_vm6, %v255_v9, %v315_v14 }
  0xd3   :  { %v145_v33 = vpop.xlane.xlu1 %144  ;;  %v264_v10 = vsel %vm205_vm2, %v263_v58, %v259_v59 }
  0xd4   :  { %v142_v35 = vpop.xlane.xlu0 %141  ;;  %v273_v62 = vrot.slane %v145_v33, %v594_v36  ;;  %v437_v33 = vld [vmem:[%s659_s2] ss:$0 sm:$0xff] }
  0xd5   :  { %v268_v63 = vrot.slane %v142_v35, %v596_v37 }
  0xd7   :  { %v151_v38 = vpop.xlane.xlu1 %150  ;;  %v269_v12 = vsel %vm212_vm3, %v268_v63, %v264_v10 }
  0xd8   :  { %v148_v40 = vpop.xlane.xlu0 %147  ;;  %v282_v2 = vrot.slane %v151_v38, %v596_v37  ;;  %v319_v23 = vsel %vm318_vm7, %v269_v12, %v317_v19 }
  0xd9   :  { %v277_v55 = vrot.slane %v148_v40, %v592_v34 }
  0xdb   :  { %v157_v47 = vpop.xlane.xlu1 %156  ;;  %v278_v7 = vsel %vm205_vm2, %v277_v55, %v273_v62 }
  0xdc   :  { %v154_v51 = vpop.xlane.xlu0 %153  ;;  %v291_v3 = vrot.slane %v157_v47, %v592_v34  ;;  %v283_v15 = vsel %vm212_vm3, %v282_v2, %v278_v7 }
  0xdd   :  { %v287_v4 = vrot.slane %v154_v51, %v594_v36  ;;  %v321_v24 = vsel %vm320_vm8, %v283_v15, %v319_v23 }
  0xdf   :  { %v163_v0 = vpop.xlane.xlu1 %162  ;;  %v292_v16 = vsel %vm205_vm2, %v291_v3, %v287_v4 }
  0xe0   :  { %v160_v5 = vpop.xlane.xlu0 %159  ;;  %v301_v21 = vrot.slane %v163_v0, %v594_v36 }
  0xe1   :  { %v296_v8 = vrot.slane %v160_v5, %v596_v37 }
  0xe3   :  { %v169_v13 = vpop.xlane.xlu1 %168  ;;  %v297_v20 = vsel %vm212_vm3, %v296_v8, %v292_v16 }
  0xe4   :  { %v166_v17 = vpop.xlane.xlu0 %165  ;;  %v310_v18 = vrot.slane %v169_v13, %v596_v37  ;;  %v323_v27 = vsel %vm322_vm9, %v297_v20, %v321_v24 }
  0xe5   :  { %v305_v22 = vrot.slane %v166_v17, %v592_v34 }
  0xe7   :  { %v306_v25 = vsel %vm205_vm2, %v305_v22, %v301_v21 }
  0xe8   :  { %v311_v28 = vsel %vm212_vm3, %v310_v18, %v306_v25 }
  0xe9   :  { %v325_v29 = vsel %vm324_vm10, %v311_v28, %v323_v27 }
  0xea   :  { %v327_v30 = vadd.f32 %v325_v29, %v49_v26 }
  0xec   :  { %329 = vst.msk [vmem:[#allocation2] sm:$0xff] %vm47_vm0, %v327_v30 }
  0xf3   :  { %v333_v31 = vld [vmem:[#allocation2] sm:$0xff] }
  0xf4   :  { %v334_v32 = vmul.f32 0.00390625, %v333_v31 }
  0xf6   :  { %450 = vmatmul.mubr.msk.f32.vlgmr.msra.gmra.mrb[0].mxu0 %vm47_vm0, %v334_v32 }
 0x1c9   :  { %v414_v34 = vpop.f32.mrb[0].mxu0 }
 0x1ca   :  { %v415_v35 = vadd.f32 %v437_v33, %v414_v34  ;;  %v451_v36 = vpop.f32.mrb[1].mxu0 }
 0x1cc   :  { %v418_v37 = vmax.f32 %v415_v35, 0.0 }
 0x1ce   :  { %420 = vst.msk [vmem:[#allocation8] sm:$0xff] %vm419_vm11, %v418_v37 }
 0x1cf   :  { %520 = shalt.err (!%p517_p6)
}
 0x1d0   :  { %s521_s2 = scalar_lea.hbm %s660_s3, 128 }
 0x1d1   :  { %p522_p7 = scmp.ne.s32.totalorder %s660_s3, %s521_s2  ;;  %p525_p8 = scmp.lt.u32.totalorder %s521_s2, %s660_s3 }
 0x1d3   :  { %p527_p9 = pnand %p525_p8, %p522_p7 }
 0x1d5   :  { %530 = shalt.err (!%p527_p9)
}
 0x1d6   :  { %430 = dma.vmem_to_hbm [thread:$0]  %s428_s14, 128, %s660_s3, [#allocation5]  }
 0x1d7   :  { %535 = dma.done.wait [#allocation5], 128  }
 0x1d8   :  { %536 = vsyncadd [#allocation5], 4294967168 }
 0x1d9   :  { %434 = vsyncpa [#allocation4], 1 }
 0x1da   :  { %435 = vsyncpa [#allocation7], 1 }
 0x1db   :  { %436 = vsyncpa [#allocation5], 1 }

</bundles_post_ra>
